<compile_context>
chip_gen: v7x
topology: tpu7x:2x2x1
jax: 0.10.0
libtpu: 0.0.40
codegen_flags: <defaults>
</compile_context>

<pallas_src>
import functools

import jax
import jax.numpy as jnp
from jax.experimental import pallas as pl
from jax.experimental.pallas import tpu as pltpu

LANE = 128
SUBLANE = 8
K_SPLIT_THRESHOLD = 2048   # flattened in_dim above which fc1 is K-tiled
K_TILE = 1024              # default K chunk when tiling (multiple of 128)


def _round_up(x, m):
    return ((x + m - 1) // m) * m


# --------------------------------------------------------------------------- #
# Kernel
# --------------------------------------------------------------------------- #
def encoder_kernel(x_ref, w1_ref, b1_ref, w23_ref, b23_ref, o_ref, h_acc):
    """Grid = (batch tiles, K tiles).  fc1 accumulates over K into an f32 VMEM
    scratch; at the last K step apply bias + ReLU and the fused fc2@z_loc
    affine map, then store the output tile.  Dropout is identity in eval."""
    k = pl.program_id(1)

    @pl.when(k == 0)
    def _():
        h_acc[...] = jnp.zeros_like(h_acc)

    h_acc[...] += jnp.dot(x_ref[...], w1_ref[...].astype(jnp.float32),
                          preferred_element_type=jnp.float32)

    @pl.when(k == pl.num_programs(1) - 1)
    def _():
        h = jnp.maximum(h_acc[...] + b1_ref[...], 0.0)
        out = jnp.dot(h, w23_ref[...].astype(jnp.float32),
                      preferred_element_type=jnp.float32) + b23_ref[...]
        o_ref[...] = out.astype(o_ref.dtype)


# --------------------------------------------------------------------------- #
# One-time parameter preparation (call at load time, not per forward)
# --------------------------------------------------------------------------- #
def prepare_params(params, *, use_bf16=False, k_tile=None, min_k_steps=1):
    """Fuse fc2+z_loc, lane-pad feature dims, decide the K tiling, and
    (optionally) store the big weight matrices in bf16 (f32 accumulation in
    the kernel; halves weight HBM traffic on v6e/v7x)."""
    w1, b1, w2, b2, w3, b3 = [jnp.asarray(p, jnp.float32) for p in params]
    in_dim, num_node = w1.shape
    hidden_dim = w3.shape[1]

    # Affine fusion (exact up to f32 re-association).
    w23 = w2 @ w3
    b23 = b2 @ w3 + b3

    # K tiling of the flattened input.
    if k_tile is None:
        k_tile = in_dim if in_dim <= K_SPLIT_THRESHOLD else K_TILE
    if k_tile >= in_dim and min_k_steps <= 1:
        tile_k, k_pad = in_dim, in_dim            # single K step, no padding
    else:
        tile_k = _round_up(min(k_tile, in_dim), LANE)
        k_pad = _round_up(max(in_dim, min_k_steps * tile_k), tile_k)

    nn_pad = _round_up(num_node, LANE)
    hd_pad = _round_up(hidden_dim, LANE)
    w_dtype = jnp.bfloat16 if use_bf16 else jnp.float32

    w1p = jnp.zeros((k_pad, nn_pad), w_dtype).at[:in_dim, :num_node].set(
        w1.astype(w_dtype))
    b1p = jnp.zeros((1, nn_pad), jnp.float32).at[:, :num_node].set(b1)
    w23p = jnp.zeros((nn_pad, hd_pad), w_dtype).at[:num_node, :hidden_dim].set(
        w23.astype(w_dtype))
    b23p = jnp.zeros((1, hd_pad), jnp.float32).at[:, :hidden_dim].set(b23)

    return dict(w1=w1p, b1=b1p, w23=w23p, b23=b23p,
                in_dim=in_dim, hidden_dim=hidden_dim,
                tile_k=tile_k, k_pad=k_pad, nn_pad=nn_pad, hd_pad=hd_pad)


# --------------------------------------------------------------------------- #
# Forward wrapper
# --------------------------------------------------------------------------- #
def encoder_forward(sequence, prepared, *, tile_b_target=8192):
    """sequence: (B, seq_len, input_dim) -> z_loc: (B, hidden_dim)."""
    B = sequence.shape[0]
    x = sequence.reshape(B, -1).astype(jnp.float32)     # nn.Flatten (x stays f32)

    in_dim = prepared["in_dim"]
    hidden_dim = prepared["hidden_dim"]
    tile_k, k_pad = prepared["tile_k"], prepared["k_pad"]
    nn_pad, hd_pad = prepared["nn_pad"], prepared["hd_pad"]
    w1p, b1p = prepared["w1"], prepared["b1"]
    w23p, b23p = prepared["w23"], prepared["b23"]
    assert x.shape[1] == in_dim

    if k_pad != in_dim:                                  # exact zero padding
        x = jnp.pad(x, ((0, 0), (0, k_pad - in_dim)))
    grid_k = k_pad // tile_k

    # ---- VMEM-budget-driven batch tile selection (per generation). ----------
    x_bytes = 4
    w_bytes = jnp.dtype(w1p.dtype).itemsize
    w1_bufs = 1 if grid_k == 1 else 2                    # resident vs streamed

    def footprint(tb):
        return (2 * tb * tile_k * x_bytes                # x blocks (dbl-buffered)
                + 2 * tb * hd_pad * 4                    # out blocks (dbl-buffered)
                + tb * nn_pad * 4                        # h accumulator scratch
                + w1_bufs * tile_k * nn_pad * w_bytes    # W1
                + nn_pad * hd_pad * w_bytes              # W23 (single buffer)
                + SUBLANE * (nn_pad + hd_pad) * 4)       # biases (sublane padded)

    try:
        vmem_cap = int(pltpu.get_tpu_info().vmem_capacity_bytes)
    except Exception:
        vmem_cap = 64 * 1024 * 1024                      # conservative (v7x core)
    budget = max(16 * 1024 * 1024, (vmem_cap * 3) // 4 - 4 * 1024 * 1024)

    b_al = _round_up(max(B, SUBLANE), SUBLANE)
    tile_b = min(_round_up(tile_b_target, SUBLANE), b_al)
    while tile_b > SUBLANE and footprint(tile_b) > budget:
        tile_b = _round_up(tile_b // 2, SUBLANE)
    # Guarantee >=2 batch steps so v7x's two TensorCores both get work.
    if tile_b >= b_al and b_al >= 2 * SUBLANE:
        tile_b = _round_up((b_al + 1) // 2, SUBLANE)

    b_pad = _round_up(b_al, tile_b)
    if b_pad != B:
        x = jnp.pad(x, ((0, b_pad - B), (0, 0)))
    grid_b = b_pad // tile_b

    vmem_limit = int(min(vmem_cap,
                         max(32 * 1024 * 1024,
                             footprint(tile_b) + 4 * 1024 * 1024)))

    cost = pl.CostEstimate(
        flops=int(2 * b_pad * (k_pad * nn_pad + nn_pad * hd_pad)),
        transcendentals=0,
        bytes_accessed=int(b_pad * k_pad * x_bytes
                           + (k_pad * nn_pad + nn_pad * hd_pad) * w_bytes
                           + b_pad * hd_pad * 4),
    )

    resident = pl.Buffered(1)                 # constant-index -> single buffer
    if grid_k == 1:
        w1_spec = pl.BlockSpec((tile_k, nn_pad), lambda i, k: (k, 0),
                               pipeline_mode=resident)
    else:
        w1_spec = pl.BlockSpec((tile_k, nn_pad), lambda i, k: (k, 0))

    out_padded = pl.pallas_call(
        encoder_kernel,
        out_shape=jax.ShapeDtypeStruct((b_pad, hd_pad), jnp.float32),
        grid=(grid_b, grid_k),
        in_specs=[
            pl.BlockSpec((tile_b, tile_k), lambda i, k: (i, k)),      # x stream
            w1_spec,                                                  # W1
            pl.BlockSpec((1, nn_pad), lambda i, k: (0, 0),
                         pipeline_mode=resident),                     # b1
            pl.BlockSpec((nn_pad, hd_pad), lambda i, k: (0, 0),
                         pipeline_mode=resident),                     # W23 (fused)
            pl.BlockSpec((1, hd_pad), lambda i, k: (0, 0),
                         pipeline_mode=resident),                     # b23 (fused)
        ],
        out_specs=pl.BlockSpec((tile_b, hd_pad), lambda i, k: (i, 0)),
        scratch_shapes=[pltpu.VMEM((tile_b, nn_pad), jnp.float32)],
        compiler_params=pltpu.CompilerParams(
            dimension_semantics=("parallel", "arbitrary"),
            vmem_limit_bytes=vmem_limit,
        ),
        cost_estimate=cost,
    )(x, w1p, b1p, w23p, b23p)

    return out_padded[:B, :hidden_dim]


# --------------------------------------------------------------------------- #
# Deterministic synthetic parameters + un-fused reference
# --------------------------------------------------------------------------- #
def init_params(key, seq_len, input_dim, hidden_dim, num_node):
    """PyTorch Linear-shaped params, stored transposed (fan_in, fan_out)."""
    in_dim = seq_len * input_dim
    ks = jax.random.split(key, 6)

    def lin(kw, kb, fan_in, fan_out):
        bound = 1.0 / jnp.sqrt(fan_in)
        w = jax.random.uniform(kw, (fan_in, fan_out), jnp.float32, -bound, bound)
        b = jax.random.uniform(kb, (1, fan_out), jnp.float32, -bound, bound)
        return w, b

    w1, b1 = lin(ks[0], ks[1], in_dim, num_node)
    w2, b2 = lin(ks[2], ks[3], num_node, num_node)
    w3, b3 = lin(ks[4], ks[5], num_node, hidden_dim)
    return (w1, b1, w2, b2, w3, b3)


def reference_forward(sequence, params):
    """Un-fused reference matching the PyTorch eval forward."""
    w1, b1, w2, b2, w3, b3 = params
    x = sequence.reshape(sequence.shape[0], -1)
    z = jnp.maximum(x @ w1 + b1, 0.0)
    z = z @ w2 + b2
    return z @ w3 + b3


if __name__ == "__main__":
    # Small shapes consistent with the module's forward.
    B, seq_len, input_dim, hidden_dim, num_node = 2, 8, 4, 16, 32
    key = jax.random.PRNGKey(0)
    k_x, k_p = jax.random.split(key)

    sequence = jax.random.normal(k_x, (B, seq_len, input_dim), jnp.float32)
    params = init_params(k_p, seq_len, input_dim, hidden_dim, num_node)

    # --- primary path: single K step, weights fully VMEM-resident.
    prepared = prepare_params(params)
    fwd = jax.jit(functools.partial(encoder_forward, prepared=prepared))
    z_loc = fwd(sequence)
    jax.block_until_ready(z_loc)

    ref = reference_forward(sequence, params)
    assert z_loc.shape == (B, hidden_dim)
    # Slightly loose tolerance: the fused (W2@W3) associativity differs from
    # the reference's two-step affine chain at the f32 rounding level.
    assert jnp.allclose(z_loc, ref, atol=1e-4, rtol=1e-4), float(
        jnp.max(jnp.abs(z_loc - ref)))

    # --- exercise the K-tiled accumulator path and a multi-step batch grid.
    B2 = 64
    seq2 = jax.random.normal(jax.random.PRNGKey(1), (B2, seq_len, input_dim),
                             jnp.float32)
    prepared_kt = prepare_params(params, min_k_steps=2)   # force 2 K steps
    fwd2 = jax.jit(functools.partial(encoder_forward, prepared=prepared_kt,
                                     tile_b_target=32))   # force 2 batch steps
    z2 = fwd2(seq2)
    jax.block_until_ready(z2)
    ref2 = reference_forward(seq2, params)
    assert z2.shape == (B2, hidden_dim)
    assert jnp.allclose(z2, ref2, atol=1e-4, rtol=1e-4), float(
        jnp.max(jnp.abs(z2 - ref2)))

    print("KERNEL_OK")
</pallas_src>

<mosaic_0001>
module attributes {stable_mosaic.version = 11 : i64} {
  func.func @encoder_kernel(%arg0: i32, %arg1: i32, %arg2: memref<8x32xf32, #tpu.memory_space<vmem>>, %arg3: memref<32x128xf32, #tpu.memory_space<vmem>>, %arg4: memref<1x128xf32, #tpu.memory_space<vmem>>, %arg5: memref<128x128xf32, #tpu.memory_space<vmem>>, %arg6: memref<1x128xf32, #tpu.memory_space<vmem>>, %arg7: memref<8x128xf32, #tpu.memory_space<vmem>>, %arg8: memref<8x128xf32, #tpu.memory_space<vmem>>) attributes {dimension_semantics = [#tpu.dimension_semantics<parallel>, #tpu.dimension_semantics<arbitrary>], iteration_bounds = array<i64: 1, 1>, scalar_prefetch = 0 : i64, scratch_operands = 1 : i64, tpu.core_type = #tpu.core_type<tc>, window_params = [{transform_indices = @transform_0, window_bounds = array<i64: 8, 32>}, {pipeline_mode = #tpu.pipeline_mode<synchronous>, transform_indices = @transform_1, window_bounds = array<i64: 32, 128>}, {pipeline_mode = #tpu.pipeline_mode<synchronous>, transform_indices = @transform_2, window_bounds = array<i64: 1, 128>}, {pipeline_mode = #tpu.pipeline_mode<synchronous>, transform_indices = @transform_3, window_bounds = array<i64: 128, 128>}, {pipeline_mode = #tpu.pipeline_mode<synchronous>, transform_indices = @transform_4, window_bounds = array<i64: 1, 128>}, {transform_indices = @transform_5, window_bounds = array<i64: 8, 128>}]} {
    %c0_i32 = arith.constant 0 : i32
    %0 = arith.cmpi eq, %arg1, %c0_i32 : i32
    %1 = arith.extui %0 : i1 to i32
    %c0_i32_0 = arith.constant 0 : i32
    %2 = arith.cmpi ne, %1, %c0_i32_0 : i32
    scf.if %2 {
      %cst_10 = arith.constant 0.000000e+00 : f32
      %12 = vector.broadcast %cst_10 : f32 to vector<8x128xf32>
      %c0_11 = arith.constant 0 : index
      %c0_12 = arith.constant 0 : index
      %13 = vector.load %arg8[%c0_11, %c0_12] : memref<8x128xf32, #tpu.memory_space<vmem>>, vector<8x128xf32>
      tpu.vector_store %arg8[%c0_11, %c0_12], %12 {strides = array<i32>} : memref<8x128xf32, #tpu.memory_space<vmem>>, vector<8x128xf32>,
    } else {
    }
    %c0 = arith.constant 0 : index
    %c0_1 = arith.constant 0 : index
    %3 = vector.load %arg8[%c0, %c0_1] : memref<8x128xf32, #tpu.memory_space<vmem>>, vector<8x128xf32>
    %c0_2 = arith.constant 0 : index
    %c0_3 = arith.constant 0 : index
    %4 = vector.load %arg2[%c0_2, %c0_3] : memref<8x32xf32, #tpu.memory_space<vmem>>, vector<8x32xf32>
    %c0_4 = arith.constant 0 : index
    %c0_5 = arith.constant 0 : index
    %5 = vector.load %arg3[%c0_4, %c0_5] : memref<32x128xf32, #tpu.memory_space<vmem>>, vector<32x128xf32>
    %cst = arith.constant dense<0.000000e+00> : vector<8x128xf32>
    %6 = tpu.matmul %4, %5, %cst {dimension_numbers = #tpu.dot_dimension_numbers<[1], [0], [0], [1], [0, 0, 1, 1], [], []>} : vector<8x32xf32>, vector<32x128xf32>, vector<8x128xf32> -> vector<8x128xf32>
    %7 = arith.addf %3, %6 : vector<8x128xf32>
    %c0_6 = arith.constant 0 : index
    %c0_7 = arith.constant 0 : index
    %8 = vector.load %arg8[%c0_6, %c0_7] : memref<8x128xf32, #tpu.memory_space<vmem>>, vector<8x128xf32>
    tpu.vector_store %arg8[%c0_6, %c0_7], %7 {strides = array<i32>} : memref<8x128xf32, #tpu.memory_space<vmem>>, vector<8x128xf32>,
    %c0_i32_8 = arith.constant 0 : i32
    %9 = arith.cmpi eq, %arg1, %c0_i32_8 : i32
    %10 = arith.extui %9 : i1 to i32
    %c0_i32_9 = arith.constant 0 : i32
    %11 = arith.cmpi ne, %10, %c0_i32_9 : i32
    scf.if %11 {
      %c0_10 = arith.constant 0 : index
      %c0_11 = arith.constant 0 : index
      %12 = vector.load %arg8[%c0_10, %c0_11] : memref<8x128xf32, #tpu.memory_space<vmem>>, vector<8x128xf32>
      %c0_12 = arith.constant 0 : index
      %c0_13 = arith.constant 0 : index
      %13 = vector.load %arg4[%c0_12, %c0_13] : memref<1x128xf32, #tpu.memory_space<vmem>>, vector<1x128xf32>
      %14 = vector.broadcast %13 : vector<1x128xf32> to vector<8x128xf32>
      %15 = arith.addf %12, %14 : vector<8x128xf32>
      %cst_14 = arith.constant 0.000000e+00 : f32
      %16 = vector.broadcast %cst_14 : f32 to vector<8x128xf32>
      %17 = arith.maximumf %15, %16 : vector<8x128xf32>
      %c0_15 = arith.constant 0 : index
      %c0_16 = arith.constant 0 : index
      %18 = vector.load %arg5[%c0_15, %c0_16] : memref<128x128xf32, #tpu.memory_space<vmem>>, vector<128x128xf32>
      %cst_17 = arith.constant dense<0.000000e+00> : vector<8x128xf32>
      %19 = tpu.matmul %17, %18, %cst_17 {dimension_numbers = #tpu.dot_dimension_numbers<[1], [0], [0], [1], [0, 0, 1, 1], [], []>} : vector<8x128xf32>, vector<128x128xf32>, vector<8x128xf32> -> vector<8x128xf32>
      %c0_18 = arith.constant 0 : index
      %c0_19 = arith.constant 0 : index
      %20 = vector.load %arg6[%c0_18, %c0_19] : memref<1x128xf32, #tpu.memory_space<vmem>>, vector<1x128xf32>
      %21 = vector.broadcast %20 : vector<1x128xf32> to vector<8x128xf32>
      %22 = arith.addf %19, %21 : vector<8x128xf32>
      %c0_20 = arith.constant 0 : index
      %c0_21 = arith.constant 0 : index
      %23 = vector.load %arg7[%c0_20, %c0_21] : memref<8x128xf32, #tpu.memory_space<vmem>>, vector<8x128xf32>
      tpu.vector_store %arg7[%c0_20, %c0_21], %22 {strides = array<i32>} : memref<8x128xf32, #tpu.memory_space<vmem>>, vector<8x128xf32>,
    } else {
    }
    return
  }
  func.func @transform_0(%arg0: i32, %arg1: i32) -> (i32, i32) {
    %c0_i32 = arith.constant 0 : i32
    return %arg0, %arg1 : i32, i32
  }
  func.func @transform_1(%arg0: i32, %arg1: i32) -> (i32, i32) {
    %c0_i32 = arith.constant 0 : i32
    %c0_i32_0 = arith.constant 0 : i32
    return %arg1, %c0_i32 : i32, i32
  }
  func.func @transform_2(%arg0: i32, %arg1: i32) -> (i32, i32) {
    %c0_i32 = arith.constant 0 : i32
    %c0_i32_0 = arith.constant 0 : i32
    %c0_i32_1 = arith.constant 0 : i32
    return %c0_i32, %c0_i32_0 : i32, i32
  }
  func.func @transform_3(%arg0: i32, %arg1: i32) -> (i32, i32) {
    %c0_i32 = arith.constant 0 : i32
    %c0_i32_0 = arith.constant 0 : i32
    %c0_i32_1 = arith.constant 0 : i32
    return %c0_i32, %c0_i32_0 : i32, i32
  }
  func.func @transform_4(%arg0: i32, %arg1: i32) -> (i32, i32) {
    %c0_i32 = arith.constant 0 : i32
    %c0_i32_0 = arith.constant 0 : i32
    %c0_i32_1 = arith.constant 0 : i32
    return %c0_i32, %c0_i32_0 : i32, i32
  }
  func.func @transform_5(%arg0: i32, %arg1: i32) -> (i32, i32) {
    %c0_i32 = arith.constant 0 : i32
    %c0_i32_0 = arith.constant 0 : i32
    return %arg0, %c0_i32 : i32, i32
  }
}

</mosaic_0001>

<bundles_post_ra>
// kernel: encoder_forward.1
= control target key start
LH: loop header
LB: loop body
LE: loop exit
PB: predicated region body
PF: predicated region fallthrough
CT: control target
= control target key end

     0   :  { %10 = vsyncpa [#allocation4], 0  ;;  %s364_s18 = smov [#allocation3]   ;;  %s436_s0 = inlined_call_operand.vmem [shape: f32[8,32], index: 0, kind: input, shape index: {}]   ;;  %s437_s1 = inlined_call_operand.vmem [shape: f32[32,128], index: 1, kind: input, shape index: {}]   ;;  %s438_s2 = inlined_call_operand.vmem [shape: f32[1,128], index: 2, kind: input, shape index: {}]   ;;  %s439_s3 = inlined_call_operand.hbm [shape: f32[128,128], index: 3, kind: input, shape index: {}]   ;;  %s440_s4 = inlined_call_operand.vmem [shape: f32[1,128], index: 4, kind: input, shape index: {}]   ;;  %s441_s5 = inlined_call_operand.vmem [shape: f32[8,128], index: 5, kind: output, shape index: {}]  }
   0x1   :  { %s22_s19 = sshll.u32 %s364_s18, 4  ;;  %s340_s22 = scalar_lea.hbm %s439_s3, 2048  ;;  %s23_s19 = int_to_ptr.vmem [resolvable:$true] %s22_s19 }
   0x2   :  { %p341_p0 = scmp.ne.s32.totalorder %s439_s3, %s340_s22  ;;  %p344_p1 = scmp.lt.u32.totalorder %s340_s22, %s439_s3 }
   0x4   :  { %p346_p2 = pnand %p344_p1, %p341_p0 }
   0x6   :  { %349 = shalt.err (!%p346_p2)
}
   0x7   :  { %s350_s27 = scalar_lea.vmem %s23_s19, 2048  ;;  %p355_p4 = scmp.lt.s32.totalorder %s23_s19, %s23_s19 }
   0x8   :  { %p351_p3 = scmp.ne.s32.totalorder %s23_s19, %s350_s27  ;;  %p356_p5 = scmp.lt.s32.totalorder %s350_s27, %s350_s27 }
   0xa   :  { %p357_p6 = por %p356_p5, %p355_p4 }
   0xc   :  { %p358_p7 = pnand %p357_p6, %p351_p3 }
   0xe   :  { %361 = shalt.err (!%p358_p7)
}
   0xf   :  { %s365_s28 = smov 128   ;;  %s366_s29 = smov 8  }
  0x10   :  { %28 = dma.hbm_to_vmem [thread:$0]  %s439_s3, 2048, %s23_s19, [#allocation4], %s365_s28, %s365_s28, %s366_s29  }
  0x11   :  { %362 = dma.done.wait [#allocation4], 2048  }
  0x12   :  { %363 = vsyncadd [#allocation4], 4294965248  ;;  %v367_v0 = vmov 0.0|0.0   ;;  %vm368_vm0 = vmmov 0   ;;  %v369_v1 = vmov 0.0   ;;  %v41_v2 = vld [vmem:[%s437_s1] sm:$0xff] }
  0x13   :  { %304 = vmatprep.subr.bf16.mxu0 %v367_v0  ;;  %266 = vmatprep.mubr.msk.f32.mxu0 %vm368_vm0, %v369_v1  ;;  %v42_v3 = vld [vmem:[%s437_s1 + $0x8] sm:$0xff]  ;;  %v43_v4 = vld [vmem:[%s437_s1 + $0x10] sm:$0xff]  ;;  %v44_v6 = vld [vmem:[%s437_s1 + $0x18] sm:$0xff]  ;;  %vm45_vm1 = vcmask 261120  }
  0x14   :  { %310 = vmatprep.subr.bf16.mxu1 %v367_v0  ;;  %301 = vmatprep.mubr.msk.f32.mxu1 %vm368_vm0, %v369_v1  ;;  %v305_v5 = vpack.c.bf16 %v42_v3, %v41_v2  ;;  %v134_v7 = vld [vmem:[#allocation3] sm:$0xff]  ;;  %v135_v8 = vld [vmem:[#allocation3 + $0x8] sm:$0xff]  ;;  %v136_v9 = vld [vmem:[#allocation3 + $0x10] sm:$0xff]  ;;  %v308_v11 = vpack.c.bf16 %v44_v6, %v43_v4 }
  0x15   :  { %v137_v10 = vld [vmem:[#allocation3 + $0x18] sm:$0xff]  ;;  %v311_v12 = vpack.c.bf16 %v135_v8, %v134_v7  ;;  %v138_v14 = vld [vmem:[#allocation3 + $0x20] sm:$0xff]  ;;  %v139_v15 = vld [vmem:[#allocation3 + $0x28] sm:$0xff] }
  0x16   :  { %306 = vmatpush3.bf16.msra.mxu0 %v305_v5  ;;  %v314_v13 = vpack.c.bf16 %v137_v10, %v136_v9  ;;  %v40_v16 = vld [vmem:[%s436_s0] sm:$0xff]  ;;  %v317_v17 = vpack.c.bf16 %v139_v15, %v138_v14  ;;  %v140_v18 = vld [vmem:[#allocation3 + $0x30] sm:$0xff]  ;;  %v141_v19 = vld [vmem:[#allocation3 + $0x38] sm:$0xff] }
  0x17   :  { %307 = vmatprep.subr.bf16.mxu0 %v367_v0  ;;  %312 = vmatpush3.bf16.msra.mxu1 %v311_v12  ;;  %v320_v20 = vpack.c.bf16 %v141_v19, %v140_v18  ;;  %v142_v21 = vld [vmem:[#allocation3 + $0x40] sm:$0xff]  ;;  %v143_v22 = vld [vmem:[#allocation3 + $0x48] sm:$0xff]  ;;  %v144_v24 = vld [vmem:[#allocation3 + $0x50] sm:$0xff] }
  0x18   :  { %313 = vmatprep.subr.bf16.mxu1 %v367_v0  ;;  %v323_v23 = vpack.c.bf16 %v143_v22, %v142_v21  ;;  %v145_v25 = vld [vmem:[#allocation3 + $0x58] sm:$0xff]  ;;  %v146_v27 = vld [vmem:[#allocation3 + $0x60] sm:$0xff]  ;;  %v147_v28 = vld [vmem:[#allocation3 + $0x68] sm:$0xff] }
  0x19   :  { %v326_v26 = vpack.c.bf16 %v145_v25, %v144_v24  ;;  %v329_v29 = vpack.c.bf16 %v147_v28, %v146_v27  ;;  %v148_v30 = vld [vmem:[#allocation3 + $0x70] sm:$0xff]  ;;  %v149_v31 = vld [vmem:[#allocation3 + $0x78] sm:$0xff]  ;;  %v234_v33 = vld [vmem:[%s438_s2] ss:$0 sm:$0xff] }
  0x1a   :  { %309 = vmatpush3.bf16.msra.mxu0 %v308_v11  ;;  %v332_v32 = vpack.c.bf16 %v149_v31, %v148_v30  ;;  %v235_v38 = vld [vmem:[%s440_s4] ss:$0 sm:$0xff] }
  0x1b   :  { %315 = vmatpush3.bf16.msra.mxu1 %v314_v13 }
  0x1c   :  { %316 = vmatprep.subr.bf16.mxu1 %v367_v0 }
  0x1d   :  { %267 = vmatmul.mubr.msk.f32.vlgmr.msra.gmra.mrb[0].mxu0 %vm45_vm1, %v40_v16 }
  0x1f   :  { %318 = vmatpush3.bf16.msra.mxu1 %v317_v17 }
  0x20   :  { %319 = vmatprep.subr.bf16.mxu1 %v367_v0 }
  0x23   :  { %321 = vmatpush3.bf16.msra.mxu1 %v320_v20 }
  0x24   :  { %322 = vmatprep.subr.bf16.mxu1 %v367_v0 }
  0x27   :  { %324 = vmatpush3.bf16.msra.mxu1 %v323_v23 }
  0x28   :  { %325 = vmatprep.subr.bf16.mxu1 %v367_v0 }
  0x2b   :  { %327 = vmatpush3.bf16.msra.mxu1 %v326_v26 }
  0x2c   :  { %328 = vmatprep.subr.bf16.mxu1 %v367_v0 }
  0x2f   :  { %330 = vmatpush3.bf16.msra.mxu1 %v329_v29 }
  0x30   :  { %331 = vmatprep.subr.bf16.mxu1 %v367_v0 }
  0x33   :  { %333 = vmatpush3.bf16.msra.mxu1 %v332_v32 }
  0xf0   :  { %v115_v34 = vpop.f32.mrb[0].mxu0 }
  0xf1   :  { %v132_v35 = vadd.f32 %v234_v33, %v115_v34  ;;  %v268_v36 = vpop.f32.mrb[1].mxu0 }
  0xf3   :  { %v133_v37 = vmax.f32 %v132_v35, 0.0 }
  0xf5   :  { %302 = vmatmul.mubr.f32.vlgmr.msra.gmra.mrb[0].mxu1 %v133_v37 }
 0x1c8   :  { %v223_v39 = vpop.f32.mrb[0].mxu1 }
 0x1c9   :  { %v224_v40 = vadd.f32 %v235_v38, %v223_v39  ;;  %v303_v41 = vpop.f32.mrb[1].mxu1 }
 0x1cb   :  { %227 = vst [vmem:[%s441_s5] sm:$0xff] %v224_v40 }
 0x1cc   :  { %232 = vsyncpa [#allocation4], 1 }

</bundles_post_ra>
